<compile_context>
chip_gen: v5e
topology: v5e:2x2
jax: 0.10.0
libtpu: 0.0.40
codegen_flags: <defaults>
</compile_context>

<pallas_src>
import functools

import jax
import jax.numpy as jnp
from jax.experimental import pallas as pl
from jax.experimental.pallas import tpu as pltpu


def _round_up(x, m):
    return ((x + m - 1) // m) * m


def _avgpool4d_kernel(x_ref, o_ref, *, kshape, oshape, order, lane_group):
    """Separable stride-1 sliding-window sums over the four pooling axes.

    x_ref is either
      * 5-D (E1, E2, E3, E4, TB): a B (batch*channel) tile on the lane axis, or
      * 4-D (E1, E2, E3, E4*B):   D4 fused with B on the lane axis (small-B path),
    with E_i = o_i + k_i - 1 (input already cropped to the touched extent).
    """
    k1, k2, k3, k4 = kshape
    o1, o2, o3, o4 = oshape
    nd = len(x_ref.shape)
    ks3 = (k1, k2, k3)
    os3 = (o1, o2, o3)

    def axslice(ax, start, size):
        return ((slice(None),) * ax + (slice(start, start + size),)
                + (slice(None),) * (nd - ax - 1))

    # Leading pooling axes (D1..D3), most-shrinking axis first.  The first stage
    # slices-and-casts straight from the ref, so no full-tile f32 copy is live.
    ax0 = order[0]
    acc = x_ref[axslice(ax0, 0, os3[ax0])].astype(jnp.float32)
    for i in range(1, ks3[ax0]):
        acc = acc + x_ref[axslice(ax0, i, os3[ax0])].astype(jnp.float32)
    for ax in order[1:]:
        nxt = acc[axslice(ax, 0, os3[ax])]
        for i in range(1, ks3[ax]):
            nxt = nxt + acc[axslice(ax, i, os3[ax])]
        acc = nxt

    # D4 stage last, on the smallest intermediate.
    if nd == 5:
        # (o1, o2, o3, E4, TB): shifts along the sublane axis.
        d = acc[:, :, :, 0:o4, :]
        for i in range(1, k4):
            d = d + acc[:, :, :, i:i + o4, :]
    else:
        # (o1, o2, o3, E4*B): fused lane axis; a D4 shift of 1 is a lane shift of B.
        d = acc[:, :, :, 0:o4 * lane_group]
        for i in range(1, k4):
            d = d + acc[:, :, :, i * lane_group:(i + o4) * lane_group]

    o_ref[...] = (d * (1.0 / float(k1 * k2 * k3 * k4))).astype(o_ref.dtype)


def avg_pool4d(x, ker_shape, stride):
    """x: (N, C, D1, D2, D3, D4) -> (N, C, O1, O2, O3, O4), as_strided semantics."""
    N, C, D1, D2, D3, D4 = x.shape
    k1, k2, k3, k4 = ker_shape
    ks = (k1, k2, k3, k4)
    dims_in = (D1, D2, D3, D4)
    os_ = tuple((d - k) // stride + 1 for d, k in zip(dims_in, ks))
    o1, o2, o3, o4 = os_
    es = tuple(o + k - 1 for o, k in zip(os_, ks))      # extent actually touched
    e1, e2, e3, e4 = es

    B = N * C
    dtype = x.dtype
    itemsize = jnp.dtype(dtype).itemsize

    # Reduce the most-shrinking leading axis first.
    order = tuple(sorted(range(3), key=lambda a: os_[a] / es[a]))

    # ---- chip-aware VMEM budgeting --------------------------------------------------
    try:
        vmem_cap = int(pltpu.get_tpu_info().vmem_capacity_bytes)
    except Exception:
        vmem_cap = 64 * 1024 * 1024                       # conservative (v7x-sized)
    if vmem_cap >= 100 * 1024 * 1024:                     # v5e / v6e: 128 MiB physical
        vmem_limit = 96 * 1024 * 1024
        budget = 64 * 1024 * 1024
    else:                                                 # v7x: 64 MiB physical
        vmem_limit = 48 * 1024 * 1024
        budget = 24 * 1024 * 1024

    sub_in = max(1, (8 * 4) // itemsize)                  # sublane tile for I/O dtype
    e4_in, o4_in = _round_up(e4, sub_in), _round_up(o4, sub_in)
    e4_f32, o4_f32 = _round_up(e4, 8), _round_up(o4, 8)

    # VMEM bytes per lane column: double-buffered I/O tiles + peak f32 intermediates
    # (minor dims rounded up to their sublane tiles).
    io_b = 2 * (e1 * e2 * e3 * e4_in + o1 * o2 * o3 * o4_in) * itemsize
    cur = [e1, e2, e3]
    inter = 0
    for ax in order:
        cur[ax] = os_[ax]
        inter += cur[0] * cur[1] * cur[2] * e4_f32
    inter += o1 * o2 * o3 * o4_f32
    per_col = io_b + 4 * inter

    # ---- advisory cost estimate (kernel is HBM-bandwidth-bound) ----------------------
    cur = [e1, e2, e3, e4]
    adds = 0
    for ax in order:
        cur[ax] = os_[ax]
        adds += (ks[ax] - 1) * cur[0] * cur[1] * cur[2] * cur[3]
    cur[3] = o4
    adds += (k4 - 1) * cur[0] * cur[1] * cur[2] * cur[3]
    in_vol = e1 * e2 * e3 * e4
    out_vol = o1 * o2 * o3 * o4
    cost = pl.CostEstimate(
        flops=int(B * (adds + out_vol)),
        transcendentals=0,
        bytes_accessed=int(B * (in_vol + out_vol) * itemsize),
    )

    # Crop to the touched extent (stride > 1) and fold N,C into one B axis; the crop is
    # fused into the single relayout pass below, so stride>1 cases read ~prod(E_i/D_i)
    # of the original HBM bytes.
    xb = x.reshape(B, D1, D2, D3, D4)
    if es != dims_in:
        xb = xb[:, :e1, :e2, :e3, :e4]

    kernel = functools.partial(_avgpool4d_kernel, kshape=ks, oshape=os_,
                               order=order, lane_group=B)

    if B < 128:
        # Small-B path: fuse D4 with B on the lane axis so stores are (o4*B)-lane
        # dense and lane/DMA occupancy is ~E4*B/128 instead of B/128.
        xt = jnp.transpose(xb, (1, 2, 3, 4, 0)).reshape(e1, e2, e3, e4 * B)
        est = per_col * B
        if est > budget:
            # TODO(synk): spatial (halo) tiling for volumes that exceed VMEM untiled.
            vmem_limit = min(max(vmem_limit, int(est * 1.25)),
                             vmem_cap - 4 * 1024 * 1024)
        # TODO(synk): with grid=1 the second v7x TensorCore idles; a D1 halo grid axis
        # would give >=2 steps for large single-image volumes.
        out = pl.pallas_call(
            kernel,
            out_shape=jax.ShapeDtypeStruct((o1, o2, o3, o4 * B), dtype),
            grid=(1,),
            in_specs=[pl.BlockSpec((e1, e2, e3, e4 * B), lambda b: (0, 0, 0, 0))],
            out_specs=pl.BlockSpec((o1, o2, o3, o4 * B), lambda b: (0, 0, 0, 0)),
            compiler_params=pltpu.CompilerParams(
                dimension_semantics=("arbitrary",),
                vmem_limit_bytes=vmem_limit),
            cost_estimate=cost,
        )(xt)
        out = out.reshape(o1, o2, o3, o4, B)
    else:
        # Large-B path: B alone on the lane axis, tiled in 128-lane multiples (no halos).
        xt = jnp.transpose(xb, (1, 2, 3, 4, 0))
        Bp = _round_up(B, 128)
        if Bp != B:
            xt = jnp.pad(xt, ((0, 0),) * 4 + ((0, Bp - B),))
        m = Bp // 128
        max_t = max(1, int(budget // (per_col * 128)))    # VMEM-limited tile width
        cap_t = m if m < 2 else max(1, m // 2)            # prefer >=2 grid steps
        t = 1
        for cand in range(min(max_t, cap_t), 0, -1):
            if m % cand == 0:
                t = cand
                break
        TB = 128 * t
        out = pl.pallas_call(
            kernel,
            out_shape=jax.ShapeDtypeStruct((o1, o2, o3, o4, Bp), dtype),
            grid=(Bp // TB,),
            in_specs=[pl.BlockSpec((e1, e2, e3, e4, TB), lambda b: (0, 0, 0, 0, b))],
            out_specs=pl.BlockSpec((o1, o2, o3, o4, TB), lambda b: (0, 0, 0, 0, b)),
            compiler_params=pltpu.CompilerParams(
                dimension_semantics=("parallel",),
                vmem_limit_bytes=vmem_limit),
            cost_estimate=cost,
        )(xt)
        if Bp != B:
            out = out[..., :B]

    out = jnp.transpose(out, (4, 0, 1, 2, 3))             # (B, o1, o2, o3, o4)
    return out.reshape(N, C, o1, o2, o3, o4)


def _avg_pool4d_ref(x, ker_shape, stride):
    """Pure-JAX reference reproducing the as_strided semantics of the module."""
    N, C, D1, D2, D3, D4 = x.shape
    k1, k2, k3, k4 = ker_shape
    o1 = (D1 - k1) // stride + 1
    o2 = (D2 - k2) // stride + 1
    o3 = (D3 - k3) // stride + 1
    o4 = (D4 - k4) // stride + 1
    acc = jnp.zeros((N, C, o1, o2, o3, o4), jnp.float32)
    for i1 in range(k1):
        for i2 in range(k2):
            for i3 in range(k3):
                for i4 in range(k4):
                    acc = acc + x[:, :, i1:i1 + o1, i2:i2 + o2,
                                  i3:i3 + o3, i4:i4 + o4].astype(jnp.float32)
    return (acc / float(k1 * k2 * k3 * k4)).astype(x.dtype)


if __name__ == "__main__":
    key = jax.random.PRNGKey(0)
    k_a, k_b, k_c = jax.random.split(key, 3)

    # Module "parameters": kernel shape + stride (no learnable weights).
    # Small-B fused-lane path, stride 1.
    x = jax.random.normal(k_a, (2, 4, 6, 6, 6, 6), dtype=jnp.float32)
    out = jax.block_until_ready(avg_pool4d(x, (2, 2, 2, 2), stride=1))
    ref = _avg_pool4d_ref(x, (2, 2, 2, 2), 1)
    assert out.shape == (2, 4, 5, 5, 5, 5), out.shape
    assert jnp.allclose(out, ref, atol=1e-5, rtol=1e-5), "mismatch (stride=1)"

    # stride > 1 exercises the output-crop (as_strided) semantics + input crop.
    x2 = jax.random.normal(k_b, (2, 4, 8, 8, 8, 8), dtype=jnp.float32)
    out2 = jax.block_until_ready(avg_pool4d(x2, (3, 2, 2, 3), stride=2))
    ref2 = _avg_pool4d_ref(x2, (3, 2, 2, 3), 2)
    assert out2.shape == ref2.shape, (out2.shape, ref2.shape)
    assert jnp.allclose(out2, ref2, atol=1e-5, rtol=1e-5), "mismatch (stride=2)"

    # Large-B path (B = N*C = 128): B on the lane axis, tiled.
    x3 = jax.random.normal(k_c, (2, 64, 6, 6, 6, 6), dtype=jnp.float32)
    out3 = jax.block_until_ready(avg_pool4d(x3, (2, 2, 2, 2), stride=1))
    ref3 = _avg_pool4d_ref(x3, (2, 2, 2, 2), 1)
    assert out3.shape == ref3.shape, (out3.shape, ref3.shape)
    assert jnp.allclose(out3, ref3, atol=1e-5, rtol=1e-5), "mismatch (large B)"

    print("KERNEL_OK")
</pallas_src>

<mosaic_0001>
module attributes {stable_mosaic.version = 11 : i64} {
  func.func @_avgpool4d_kernel(%arg0: i32, %arg1: memref<6x6x6x48xf32, #tpu.memory_space<vmem>>, %arg2: memref<5x5x5x40xf32, #tpu.memory_space<vmem>>) attributes {dimension_semantics = [#tpu.dimension_semantics<arbitrary>], iteration_bounds = array<i64: 1>, scalar_prefetch = 0 : i64, scratch_operands = 0 : i64, tpu.core_type = #tpu.core_type<tc>, window_params = [{pipeline_mode = #tpu.pipeline_mode<synchronous>, transform_indices = @transform_0, window_bounds = array<i64: 6, 6, 6, 48>}, {pipeline_mode = #tpu.pipeline_mode<synchronous>, transform_indices = @transform_1, window_bounds = array<i64: 5, 5, 5, 40>}]} {
    %c0 = arith.constant 0 : index
    %c0_0 = arith.constant 0 : index
    %c0_1 = arith.constant 0 : index
    %c0_2 = arith.constant 0 : index
    %0 = vector.load %arg1[%c0, %c0_0, %c0_1, %c0_2] : memref<6x6x6x48xf32, #tpu.memory_space<vmem>>, vector<5x6x6x48xf32>
    %c1 = arith.constant 1 : index
    %c0_3 = arith.constant 0 : index
    %c0_4 = arith.constant 0 : index
    %c0_5 = arith.constant 0 : index
    %1 = vector.load %arg1[%c1, %c0_3, %c0_4, %c0_5] : memref<6x6x6x48xf32, #tpu.memory_space<vmem>>, vector<5x6x6x48xf32>
    %2 = arith.addf %0, %1 : vector<5x6x6x48xf32>
    %3 = vector.extract_strided_slice %2 {offsets = [0, 0, 0, 0], sizes = [5, 5, 6, 48], strides = [1, 1, 1, 1]} : vector<5x6x6x48xf32> to vector<5x5x6x48xf32>
    %4 = vector.extract_strided_slice %2 {offsets = [0, 1, 0, 0], sizes = [5, 5, 6, 48], strides = [1, 1, 1, 1]} : vector<5x6x6x48xf32> to vector<5x5x6x48xf32>
    %5 = arith.addf %3, %4 : vector<5x5x6x48xf32>
    %6 = vector.extract_strided_slice %5 {offsets = [0, 0, 0, 0], sizes = [5, 5, 5, 48], strides = [1, 1, 1, 1]} : vector<5x5x6x48xf32> to vector<5x5x5x48xf32>
    %7 = vector.extract_strided_slice %5 {offsets = [0, 0, 1, 0], sizes = [5, 5, 5, 48], strides = [1, 1, 1, 1]} : vector<5x5x6x48xf32> to vector<5x5x5x48xf32>
    %8 = arith.addf %6, %7 : vector<5x5x5x48xf32>
    %9 = vector.extract_strided_slice %8 {offsets = [0, 0, 0, 0], sizes = [5, 5, 5, 40], strides = [1, 1, 1, 1]} : vector<5x5x5x48xf32> to vector<5x5x5x40xf32>
    %10 = vector.extract_strided_slice %8 {offsets = [0, 0, 0, 8], sizes = [5, 5, 5, 40], strides = [1, 1, 1, 1]} : vector<5x5x5x48xf32> to vector<5x5x5x40xf32>
    %11 = arith.addf %9, %10 : vector<5x5x5x40xf32>
    %cst = arith.constant 6.250000e-02 : f32
    %12 = vector.broadcast %cst : f32 to vector<5x5x5x40xf32>
    %13 = arith.mulf %11, %12 : vector<5x5x5x40xf32>
    %c0_6 = arith.constant 0 : index
    %c0_7 = arith.constant 0 : index
    %c0_8 = arith.constant 0 : index
    %c0_9 = arith.constant 0 : index
    %14 = vector.load %arg2[%c0_6, %c0_7, %c0_8, %c0_9] : memref<5x5x5x40xf32, #tpu.memory_space<vmem>>, vector<5x5x5x40xf32>
    tpu.vector_store %arg2[%c0_6, %c0_7, %c0_8, %c0_9], %13 {strides = array<i32>} : memref<5x5x5x40xf32, #tpu.memory_space<vmem>>, vector<5x5x5x40xf32>,
    return
  }
  func.func @transform_0(%arg0: i32) -> (i32, i32, i32, i32) {
    %c0_i32 = arith.constant 0 : i32
    %c0_i32_0 = arith.constant 0 : i32
    %c0_i32_1 = arith.constant 0 : i32
    %c0_i32_2 = arith.constant 0 : i32
    %c0_i32_3 = arith.constant 0 : i32
    return %c0_i32, %c0_i32_0, %c0_i32_1, %c0_i32_2 : i32, i32, i32, i32
  }
  func.func @transform_1(%arg0: i32) -> (i32, i32, i32, i32) {
    %c0_i32 = arith.constant 0 : i32
    %c0_i32_0 = arith.constant 0 : i32
    %c0_i32_1 = arith.constant 0 : i32
    %c0_i32_2 = arith.constant 0 : i32
    %c0_i32_3 = arith.constant 0 : i32
    return %c0_i32, %c0_i32_0, %c0_i32_1, %c0_i32_2 : i32, i32, i32, i32
  }
}

</mosaic_0001>

<bundles_post_ra>
// kernel: tpu_custom_call.1
= control target key start
LH: loop header
LB: loop body
LE: loop exit
PB: predicated region body
PF: predicated region fallthrough
CT: control target
= control target key end

     0   :  { %6 = vsyncpa [#allocation3], 0  ;;  %s670_s0 = inlined_call_operand.hbm [shape: f32[6,6,6,48], index: 0, kind: input, shape index: {}]   ;;  %s671_s1 = inlined_call_operand.hbm [shape: f32[5,5,5,40], index: 1, kind: output, shape index: {}]  }
   0x1   :  { %7 = vsyncpa [#allocation4], 0  ;;  %s12_s8 = sshll.u32 %s670_s0, 4  ;;  %s493_s9 = smov [#allocation2]   ;;  %s13_s8 = int_to_ptr.hbm [resolvable:$true] %s12_s8 }
   0x2   :  { %s14_s10 = sshll.u32 %s493_s9, 4  ;;  %s494_s11 = smov 128   ;;  %s15_s10 = int_to_ptr.vmem [resolvable:$true] %s14_s10 }
   0x3   :  { %s495_s12 = smov 8  }
   0x4   :  { %20 = dma.hbm_to_vmem [thread:$0]  %s13_s8, 4608, %s15_s10, [#allocation3], %s494_s11, %s494_s11, %s495_s12  }
   0x5   :  { %489 = dma.done.wait [#allocation3], 4608  }
   0x6   :  { %490 = vsyncadd [#allocation3], 4294962688  ;;  %v25_v0 = vld [vmem:[#allocation2] sm:$0x3f]  ;;  %v26_v1 = vld [vmem:[#allocation2 + $0x8] sm:$0x3f] }
   0x7   :  { %v56_v2 = vld [vmem:[#allocation2 + $0x30] sm:$0x3f]  ;;  %v57_v3 = vld [vmem:[#allocation2 + $0x38] sm:$0x3f]  ;;  %v58_v8 = vld [vmem:[#allocation2 + $0x40] sm:$0x3f] }
   0x8   :  { %v86_v4 = vadd.f32 %v56_v2, %v25_v0  ;;  %v27_v5 = vld [vmem:[#allocation2 + $0x10] sm:$0x3f]  ;;  %v28_v6 = vld [vmem:[#allocation2 + $0x18] sm:$0x3f]  ;;  %v87_v7 = vadd.f32 %v57_v3, %v26_v1  ;;  %v59_v9 = vld [vmem:[#allocation2 + $0x48] sm:$0x3f] }
   0x9   :  { %v29_v10 = vld [vmem:[#allocation2 + $0x20] sm:$0x3f]  ;;  %v88_v11 = vadd.f32 %v58_v8, %v27_v5  ;;  %v89_v12 = vadd.f32 %v59_v9, %v28_v6  ;;  %v60_v13 = vld [vmem:[#allocation2 + $0x50] sm:$0x3f]  ;;  %v32_v17 = vld [vmem:[#allocation2 + $0x38] sm:$0x3f] }
   0xa   :  { %v116_v14 = vadd.f32 %v87_v7, %v86_v4  ;;  %v90_v15 = vadd.f32 %v60_v13, %v29_v10  ;;  %v33_v18 = vld [vmem:[#allocation2 + $0x40] sm:$0x3f]  ;;  %v63_v21 = vld [vmem:[#allocation2 + $0x68] sm:$0x3f]  ;;  %v64_v22 = vld [vmem:[#allocation2 + $0x70] sm:$0x3f] }
   0xb   :  { %v118_v16 = vadd.f32 %v89_v12, %v88_v11  ;;  %v117_v20 = vadd.f32 %v88_v11, %v87_v7  ;;  %v30_v25 = vld [vmem:[#allocation2 + $0x28] sm:$0x3f]  ;;  %v61_v26 = vld [vmem:[#allocation2 + $0x58] sm:$0x3f]  ;;  %s496_s0 = smov 120   ;;  %v93_v33 = vadd.f32 %v63_v21, %v32_v17  ;;  %v94_v34 = vadd.f32 %v64_v22, %v33_v18  ;;  %s497_s13 = smov [#allocation5]  }
   0xc   :  { %v166_v19 = vrot.slane %v116_v14, 1  ;;  %v119_v24 = vadd.f32 %v90_v15, %v89_v12  ;;  %v34_v28 = vld [vmem:[#allocation2 + $0x48] sm:$0x3f]  ;;  %v65_v29 = vld [vmem:[#allocation2 + $0x78] sm:$0x3f]  ;;  %v91_v31 = vadd.f32 %v61_v26, %v30_v25  ;;  %vm391_vm0 = vcmask 323584  }
   0xd   :  { %v168_v23 = vrot.slane %v118_v16, 1  ;;  %v167_v32 = vrot.slane %v117_v20, 1  ;;  %v95_v36 = vadd.f32 %v65_v29, %v34_v28  ;;  %v31_v38 = vld [vmem:[#allocation2 + $0x30] sm:$0x3f]  ;;  %v62_v39 = vld [vmem:[#allocation2 + $0x60] sm:$0x3f]  ;;  %v122_v43 = vadd.f32 %v94_v34, %v93_v33 }
   0xe   :  { %v514_v27 = vadd.f32 %v166_v19, %v116_v14  ;;  %v169_v35 = vrot.slane %v119_v24, 1  ;;  %v120_v37 = vadd.f32 %v91_v31, %v90_v15  ;;  %v92_v41 = vadd.f32 %v62_v39, %v31_v38  ;;  %v35_v44 = vld [vmem:[#allocation2 + $0x50] sm:$0x3f]  ;;  %v36_v45 = vld [vmem:[#allocation2 + $0x58] sm:$0x3f]  ;;  %s421_s14 = sshll.u32 %s497_s13, 4  ;;  %s422_s14 = int_to_ptr.vmem [resolvable:$true] %s421_s14 }
   0xf   :  { %v516_v30 = vadd.f32 %v168_v23, %v118_v16  ;;  %v522_v42 = vadd.f32 %v167_v32, %v117_v20  ;;  %v123_v47 = vadd.f32 %v95_v36, %v94_v34  ;;  %v66_v48 = vld [vmem:[#allocation2 + $0x80] sm:$0x3f]  ;;  %v67_v49 = vld [vmem:[#allocation2 + $0x88] sm:$0x3f]  ;;  %v68_v54 = vld [vmem:[#allocation2 + $0x90] sm:$0x3f] }
  0x10   :  { %266 = vrot.lane.b32.xlu0 %v514_v27, %s496_s0  ;;  %v170_v40 = vrot.slane %v120_v37, 1  ;;  %v524_v46 = vadd.f32 %v169_v35, %v119_v24  ;;  %v37_v51 = vld [vmem:[#allocation2 + $0x60] sm:$0x3f]  ;;  %v121_v52 = vadd.f32 %v93_v33, %v92_v41  ;;  %v38_v53 = vld [vmem:[#allocation2 + $0x68] sm:$0x3f]  ;;  %v172_v57 = vrot.slane %v122_v43, 1 }
  0x11   :  { %270 = vrot.lane.b32.xlu1 %v516_v30, %s496_s0  ;;  %v69_v55 = vld [vmem:[#allocation2 + $0x98] sm:$0x3f]  ;;  %v96_v58 = vadd.f32 %v66_v48, %v35_v44  ;;  %v97_v59 = vadd.f32 %v67_v49, %v36_v45  ;;  %v173_v60 = vrot.slane %v123_v47, 1  ;;  %v98_v61 = vadd.f32 %v68_v54, %v37_v51  ;;  %v39_v3 = vld [vmem:[#allocation2 + $0x70] sm:$0x3f]  ;;  %s423_s17 = sshll.u32 %s671_s1, 4  ;;  %s424_s17 = int_to_ptr.hbm [resolvable:$true] %s423_s17 }
  0x12   :  { %v526_v50 = vadd.f32 %v170_v40, %v120_v37  ;;  %v171_v56 = vrot.slane %v121_v52, 1  ;;  %v99_v62 = vadd.f32 %v69_v55, %v38_v53  ;;  %v536_v1 = vadd.f32 %v172_v57, %v122_v43  ;;  %v40_v6 = vld [vmem:[#allocation2 + $0x78] sm:$0x3f]  ;;  %v70_v7 = vld [vmem:[#allocation2 + $0xa0] sm:$0x3f] }
  0x13   :  { %v124_v0 = vadd.f32 %v96_v58, %v95_v36  ;;  %v125_v2 = vadd.f32 %v97_v59, %v96_v58  ;;  %v538_v4 = vadd.f32 %v173_v60, %v123_v47  ;;  %v71_v8 = vld [vmem:[#allocation2 + $0xa8] sm:$0x3f]  ;;  %v41_v9 = vld [vmem:[#allocation2 + $0x80] sm:$0x3f]  ;;  %v72_v10 = vld [vmem:[#allocation2 + $0xb0] sm:$0x3f]  ;;  %v100_v13 = vadd.f32 %v70_v7, %v39_v3 }
  0x14   :  { %274 = vrot.lane.b32.xlu2 %v526_v50, %s496_s0  ;;  %v534_v63 = vadd.f32 %v171_v56, %v121_v52  ;;  %v126_v5 = vadd.f32 %v99_v62, %v98_v61  ;;  %v101_v14 = vadd.f32 %v71_v8, %v40_v6  ;;  %v102_v16 = vadd.f32 %v72_v10, %v41_v9  ;;  %v43_v21 = vld [vmem:[#allocation2 + $0x90] sm:$0x3f]  ;;  %v44_v24 = vld [vmem:[#allocation2 + $0x98] sm:$0x3f]  ;;  %v74_v25 = vld [vmem:[#allocation2 + $0xc0] sm:$0x3f] }
  0x15   :  { %v174_v11 = vrot.slane %v124_v0, 1  ;;  %v175_v12 = vrot.slane %v125_v2, 1  ;;  %v127_v18 = vadd.f32 %v100_v13, %v99_v62  ;;  %v75_v26 = vld [vmem:[#allocation2 + $0xc8] sm:$0x3f]  ;;  %v45_v28 = vld [vmem:[#allocation2 + $0xa0] sm:$0x3f]  ;;  %v104_v35 = vadd.f32 %v74_v25, %v43_v21 }
  0x16   :  { %v176_v15 = vrot.slane %v126_v5, 1  ;;  %v128_v20 = vadd.f32 %v101_v14, %v100_v13  ;;  %v129_v23 = vadd.f32 %v102_v16, %v101_v14  ;;  %v76_v29 = vld [vmem:[#allocation2 + $0xd0] sm:$0x3f]  ;;  %v42_v32 = vld [vmem:[#allocation2 + $0x88] sm:$0x3f]  ;;  %v105_v36 = vadd.f32 %v75_v26, %v44_v24 }
  0x17   :  { %v546_v17 = vadd.f32 %v174_v11, %v124_v0  ;;  %v548_v19 = vadd.f32 %v175_v12, %v125_v2  ;;  %v177_v31 = vrot.slane %v127_v18, 1  ;;  %v73_v33 = vld [vmem:[#allocation2 + $0xb8] sm:$0x3f]  ;;  %v106_v39 = vadd.f32 %v76_v29, %v45_v28  ;;  %v46_v45 = vld [vmem:[#allocation2 + $0xa8] sm:$0x3f] }
  0x18   :  { %268 = vrot.lane.b32.xlu0 %v522_v42, %s496_s0  ;;  %v550_v22 = vadd.f32 %v176_v15, %v126_v5  ;;  %v178_v34 = vrot.slane %v128_v20, 1  ;;  %v103_v37 = vadd.f32 %v73_v33, %v42_v32  ;;  %v179_v38 = vrot.slane %v129_v23, 1  ;;  %v47_v49 = vld [vmem:[#allocation2 + $0xb0] sm:$0x3f]  ;;  %v77_v51 = vld [vmem:[#allocation2 + $0xd8] sm:$0x3f] }
  0x19   :  { %272 = vrot.lane.b32.xlu1 %v524_v46, %s496_s0  ;;  %v558_v40 = vadd.f32 %v177_v31, %v127_v18  ;;  %v131_v44 = vadd.f32 %v105_v36, %v104_v35  ;;  %v132_v48 = vadd.f32 %v106_v39, %v105_v36  ;;  %v78_v52 = vld [vmem:[#allocation2 + $0xe0] sm:$0x3f]  ;;  %v48_v53 = vld [vmem:[#allocation2 + $0xb8] sm:$0x3f]  ;;  %v79_v54 = vld [vmem:[#allocation2 + $0xe8] sm:$0x3f]  ;;  %v107_v57 = vadd.f32 %v77_v51, %v46_v45 }
  0x1a   :  { %v130_v41 = vadd.f32 %v103_v37, %v102_v16  ;;  %v560_v43 = vadd.f32 %v178_v34, %v128_v20  ;;  %v562_v47 = vadd.f32 %v179_v38, %v129_v23  ;;  %v108_v58 = vadd.f32 %v78_v52, %v47_v49  ;;  %v50_v3 = vld [vmem:[#allocation2 + $0xc8] sm:$0x3f]  ;;  %v49_v5 = vld [vmem:[#allocation2 + $0xc0] sm:$0x3f]  ;;  %v80_v6 = vld [vmem:[#allocation2 + $0xf0] sm:$0x3f] }
  0x1b   :  { %v181_v56 = vrot.slane %v131_v44, 1  ;;  %v182_v59 = vrot.slane %v132_v48, 1  ;;  %v109_v60 = vadd.f32 %v79_v54, %v48_v53  ;;  %v133_v62 = vadd.f32 %v107_v57, %v106_v39  ;;  %v51_v9 = vld [vmem:[#allocation2 + $0xd0] sm:$0x3f]  ;;  %v81_v10 = vld [vmem:[#allocation2 + $0xf8] sm:$0x3f] }
  0x1c   :  { %276 = vrot.lane.b32.xlu2 %v534_v63, %s496_s0  ;;  %v180_v55 = vrot.slane %v130_v41, 1  ;;  %v134_v2 = vadd.f32 %v108_v58, %v107_v57  ;;  %v82_v11 = vld [vmem:[#allocation2 + $0x100] sm:$0x3f]  ;;  %v52_v12 = vld [vmem:[#allocation2 + $0xd8] sm:$0x3f]  ;;  %v110_v15 = vadd.f32 %v80_v6, %v49_v5  ;;  %v111_v18 = vadd.f32 %v81_v10, %v50_v3 }
  0x1d   :  { %v572_v0 = vadd.f32 %v181_v56, %v131_v44  ;;  %v574_v7 = vadd.f32 %v182_v59, %v132_v48  ;;  %v135_v8 = vadd.f32 %v109_v60, %v108_v58  ;;  %v83_v13 = vld [vmem:[#allocation2 + $0x108] sm:$0x3f]  ;;  %v183_v14 = vrot.slane %v133_v62, 1  ;;  %v53_v29 = vld [vmem:[#allocation2 + $0xe0] sm:$0x3f] }
  0x1e   :  { %v570_v61 = vadd.f32 %v180_v55, %v130_v41  ;;  %v184_v16 = vrot.slane %v134_v2, 1  ;;  %v112_v20 = vadd.f32 %v82_v11, %v51_v9  ;;  %v113_v23 = vadd.f32 %v83_v13, %v52_v12  ;;  %v54_v33 = vld [vmem:[#allocation2 + $0xe8] sm:$0x3f]  ;;  %v84_v34 = vld [vmem:[#allocation2 + $0x110] sm:$0x3f] }
  0x1f   :  { %v185_v21 = vrot.slane %v135_v8, 1  ;;  %v582_v24 = vadd.f32 %v183_v14, %v133_v62  ;;  %v136_v25 = vadd.f32 %v111_v18, %v110_v15  ;;  %v85_v35 = vld [vmem:[#allocation2 + $0x118] sm:$0x3f]  ;;  %v114_v38 = vadd.f32 %v84_v34, %v53_v29 }
  0x20   :  { %278 = vrot.lane.b32.xlu0 %v536_v1, %s496_s0  ;;  %v584_v26 = vadd.f32 %v184_v16, %v134_v2  ;;  %v137_v28 = vadd.f32 %v112_v20, %v111_v18  ;;  %v138_v32 = vadd.f32 %v113_v23, %v112_v20  ;;  %v115_v39 = vadd.f32 %v85_v35, %v54_v33 }
  0x21   :  { %280 = vrot.lane.b32.xlu1 %v538_v4, %s496_s0  ;;  %v586_v31 = vadd.f32 %v185_v21, %v135_v8  ;;  %v186_v36 = vrot.slane %v136_v25, 1  ;;  %v139_v45 = vadd.f32 %v114_v38, %v113_v23 }
  0x22   :  { %v187_v37 = vrot.slane %v137_v28, 1  ;;  %v188_v41 = vrot.slane %v138_v32, 1  ;;  %v140_v49 = vadd.f32 %v115_v39, %v114_v38 }
  0x23   :  { %v594_v44 = vadd.f32 %v186_v36, %v136_v25  ;;  %v189_v52 = vrot.slane %v139_v45, 1 }
  0x24   :  { %282 = vrot.lane.b32.xlu2 %v546_v17, %s496_s0  ;;  %v596_v48 = vadd.f32 %v187_v37, %v137_v28  ;;  %v598_v51 = vadd.f32 %v188_v41, %v138_v32  ;;  %v190_v53 = vrot.slane %v140_v49, 1 }
  0x25   :  { %v606_v54 = vadd.f32 %v189_v52, %v139_v45 }
  0x26   :  { %v608_v55 = vadd.f32 %v190_v53, %v140_v49 }
  0x28   :  { %284 = vrot.lane.b32.xlu0 %v548_v19, %s496_s0 }
  0x29   :  { %286 = vrot.lane.b32.xlu1 %v550_v22, %s496_s0 }
  0x2c   :  { %288 = vrot.lane.b32.xlu2 %v558_v40, %s496_s0 }
  0x30   :  { %290 = vrot.lane.b32.xlu0 %v560_v43, %s496_s0 }
  0x31   :  { %292 = vrot.lane.b32.xlu1 %v562_v47, %s496_s0 }
  0x34   :  { %294 = vrot.lane.b32.xlu2 %v570_v61, %s496_s0 }
  0x38   :  { %296 = vrot.lane.b32.xlu0 %v572_v0, %s496_s0 }
  0x39   :  { %298 = vrot.lane.b32.xlu1 %v574_v7, %s496_s0 }
  0x3c   :  { %300 = vrot.lane.b32.xlu2 %v582_v24, %s496_s0 }
  0x40   :  { %302 = vrot.lane.b32.xlu0 %v584_v26, %s496_s0 }
  0x41   :  { %304 = vrot.lane.b32.xlu1 %v586_v31, %s496_s0 }
  0x44   :  { %306 = vrot.lane.b32.xlu2 %v594_v44, %s496_s0 }
  0x48   :  { %308 = vrot.lane.b32.xlu0 %v596_v48, %s496_s0 }
  0x49   :  { %310 = vrot.lane.b32.xlu1 %v598_v51, %s496_s0 }
  0x4c   :  { %312 = vrot.lane.b32.xlu2 %v606_v54, %s496_s0 }
  0x50   :  { %314 = vrot.lane.b32.xlu0 %v608_v55, %s496_s0 }
  0x6e   :  { %v275_v56 = vpop.permute.xlu2 %274 }
  0x6f   :  { %v345_v57 = vadd.f32 %v275_v56, %v526_v50 }
  0x71   :  { %v370_v58 = vmul.f32 0.0625, %v345_v57 }
  0x73   :  { %396 = vst.msk [vmem:[#allocation5 + $0x20] sm:$0x1f] %vm391_vm0, %v370_v58 }
  0x76   :  { %v277_v59 = vpop.permute.xlu2 %276 }
  0x77   :  { %v346_v60 = vadd.f32 %v277_v59, %v534_v63 }
  0x79   :  { %v371_v62 = vmul.f32 0.0625, %v346_v60 }
  0x7b   :  { %397 = vst.msk [vmem:[#allocation5 + $0x28] sm:$0x1f] %vm391_vm0, %v371_v62 }
  0x7e   :  { %v283_v2 = vpop.permute.xlu2 %282 }
  0x7f   :  { %v349_v5 = vadd.f32 %v283_v2, %v546_v17 }
  0x81   :  { %v374_v50 = vmul.f32 0.0625, %v349_v5 }
  0x82   :  { %v267_v3 = vpop.permute.xlu0 %266 }
  0x83   :  { %v341_v6 = vadd.f32 %v267_v3, %v514_v27  ;;  %v271_v8 = vpop.permute.xlu1 %270  ;;  %400 = vst.msk [vmem:[#allocation5 + $0x40] sm:$0x1f] %vm391_vm0, %v374_v50 }
  0x84   :  { %v343_v9 = vadd.f32 %v271_v8, %v516_v30 }
  0x85   :  { %v366_v10 = vmul.f32 0.0625, %v341_v6 }
  0x86   :  { %v368_v11 = vmul.f32 0.0625, %v343_v9  ;;  %v289_v63 = vpop.permute.xlu2 %288 }
  0x87   :  { %392 = vst.msk [vmem:[#allocation5] sm:$0x1f] %vm391_vm0, %v366_v10  ;;  %v352_v13 = vadd.f32 %v289_v63, %v558_v40 }
  0x88   :  { %394 = vst.msk [vmem:[#allocation5 + $0x10] sm:$0x1f] %vm391_vm0, %v368_v11 }
  0x89   :  { %v377_v15 = vmul.f32 0.0625, %v352_v13 }
  0x8a   :  { %v269_v12 = vpop.permute.xlu0 %268 }
  0x8b   :  { %v342_v17 = vadd.f32 %v269_v12, %v522_v42  ;;  %v273_v14 = vpop.permute.xlu1 %272  ;;  %403 = vst.msk [vmem:[#allocation5 + $0x58] sm:$0x1f] %vm391_vm0, %v377_v15 }
  0x8c   :  { %v344_v27 = vadd.f32 %v273_v14, %v524_v46 }
  0x8d   :  { %v367_v30 = vmul.f32 0.0625, %v342_v17 }
  0x8e   :  { %v369_v16 = vmul.f32 0.0625, %v344_v27  ;;  %v295_v18 = vpop.permute.xlu2 %294 }
  0x8f   :  { %393 = vst.msk [vmem:[#allocation5 + $0x8] sm:$0x1f] %vm391_vm0, %v367_v30  ;;  %v355_v21 = vadd.f32 %v295_v18, %v570_v61 }
  0x90   :  { %395 = vst.msk [vmem:[#allocation5 + $0x18] sm:$0x1f] %vm391_vm0, %v369_v16 }
  0x91   :  { %v380_v25 = vmul.f32 0.0625, %v355_v21 }
  0x92   :  { %v279_v20 = vpop.permute.xlu0 %278 }
  0x93   :  { %v347_v40 = vadd.f32 %v279_v20, %v536_v1  ;;  %v281_v23 = vpop.permute.xlu1 %280  ;;  %406 = vst.msk [vmem:[#allocation5 + $0x70] sm:$0x1f] %vm391_vm0, %v380_v25 }
  0x94   :  { %v348_v42 = vadd.f32 %v281_v23, %v538_v4 }
  0x95   :  { %v372_v46 = vmul.f32 0.0625, %v347_v40 }
  0x96   :  { %v373_v28 = vmul.f32 0.0625, %v348_v42  ;;  %v301_v29 = vpop.permute.xlu2 %300 }
  0x97   :  { %398 = vst.msk [vmem:[#allocation5 + $0x30] sm:$0x1f] %vm391_vm0, %v372_v46  ;;  %v358_v33 = vadd.f32 %v301_v29, %v582_v24 }
  0x98   :  { %399 = vst.msk [vmem:[#allocation5 + $0x38] sm:$0x1f] %vm391_vm0, %v373_v28 }
  0x99   :  { %v383_v35 = vmul.f32 0.0625, %v358_v33 }
  0x9a   :  { %v285_v32 = vpop.permute.xlu0 %284 }
  0x9b   :  { %v350_v61 = vadd.f32 %v285_v32, %v548_v19  ;;  %v287_v34 = vpop.permute.xlu1 %286  ;;  %409 = vst.msk [vmem:[#allocation5 + $0x88] sm:$0x1f] %vm391_vm0, %v383_v35 }
  0x9c   :  { %v351_v1 = vadd.f32 %v287_v34, %v550_v22 }
  0x9d   :  { %v375_v4 = vmul.f32 0.0625, %v350_v61 }
  0x9e   :  { %v376_v36 = vmul.f32 0.0625, %v351_v1  ;;  %v307_v37 = vpop.permute.xlu2 %306 }
  0x9f   :  { %401 = vst.msk [vmem:[#allocation5 + $0x48] sm:$0x1f] %vm391_vm0, %v375_v4  ;;  %v361_v39 = vadd.f32 %v307_v37, %v594_v44 }
  0xa0   :  { %402 = vst.msk [vmem:[#allocation5 + $0x50] sm:$0x1f] %vm391_vm0, %v376_v36 }
  0xa1   :  { %v386_v45 = vmul.f32 0.0625, %v361_v39 }
  0xa2   :  { %v291_v38 = vpop.permute.xlu0 %290 }
  0xa3   :  { %v353_v24 = vadd.f32 %v291_v38, %v560_v43  ;;  %v293_v41 = vpop.permute.xlu1 %292  ;;  %412 = vst.msk [vmem:[#allocation5 + $0xa0] sm:$0x1f] %vm391_vm0, %v386_v45 }
  0xa4   :  { %v354_v19 = vadd.f32 %v293_v41, %v562_v47 }
  0xa5   :  { %v378_v22 = vmul.f32 0.0625, %v353_v24 }
  0xa6   :  { %v379_v49 = vmul.f32 0.0625, %v354_v19  ;;  %v313_v52 = vpop.permute.xlu2 %312 }
  0xa7   :  { %404 = vst.msk [vmem:[#allocation5 + $0x60] sm:$0x1f] %vm391_vm0, %v378_v22  ;;  %v364_v56 = vadd.f32 %v313_v52, %v606_v54 }
  0xa8   :  { %405 = vst.msk [vmem:[#allocation5 + $0x68] sm:$0x1f] %vm391_vm0, %v379_v49 }
  0xa9   :  { %v389_v58 = vmul.f32 0.0625, %v364_v56 }
  0xaa   :  { %v297_v53 = vpop.permute.xlu0 %296 }
  0xab   :  { %v356_v44 = vadd.f32 %v297_v53, %v572_v0  ;;  %v299_v57 = vpop.permute.xlu1 %298  ;;  %415 = vst.msk [vmem:[#allocation5 + $0xb8] sm:$0x1f] %vm391_vm0, %v389_v58 }
  0xac   :  { %v357_v43 = vadd.f32 %v299_v57, %v574_v7 }
  0xad   :  { %v381_v47 = vmul.f32 0.0625, %v356_v44 }
  0xae   :  { %v382_v59 = vmul.f32 0.0625, %v357_v43 }
  0xaf   :  { %407 = vst.msk [vmem:[#allocation5 + $0x78] sm:$0x1f] %vm391_vm0, %v381_v47 }
  0xb0   :  { %408 = vst.msk [vmem:[#allocation5 + $0x80] sm:$0x1f] %vm391_vm0, %v382_v59 }
  0xb2   :  { %v303_v60 = vpop.permute.xlu0 %302 }
  0xb3   :  { %v359_v62 = vadd.f32 %v303_v60, %v584_v26  ;;  %v305_v2 = vpop.permute.xlu1 %304 }
  0xb4   :  { %v360_v54 = vadd.f32 %v305_v2, %v586_v31 }
  0xb5   :  { %v384_v3 = vmul.f32 0.0625, %v359_v62 }
  0xb6   :  { %v385_v0 = vmul.f32 0.0625, %v360_v54 }
  0xb7   :  { %410 = vst.msk [vmem:[#allocation5 + $0x90] sm:$0x1f] %vm391_vm0, %v384_v3 }
  0xb8   :  { %411 = vst.msk [vmem:[#allocation5 + $0x98] sm:$0x1f] %vm391_vm0, %v385_v0 }
  0xba   :  { %v309_v7 = vpop.permute.xlu0 %308 }
  0xbb   :  { %v362_v5 = vadd.f32 %v309_v7, %v596_v48  ;;  %v311_v6 = vpop.permute.xlu1 %310 }
  0xbc   :  { %v363_v8 = vadd.f32 %v311_v6, %v598_v51 }
  0xbd   :  { %v387_v9 = vmul.f32 0.0625, %v362_v5 }
  0xbe   :  { %v388_v50 = vmul.f32 0.0625, %v363_v8 }
  0xbf   :  { %413 = vst.msk [vmem:[#allocation5 + $0xa8] sm:$0x1f] %vm391_vm0, %v387_v9 }
  0xc0   :  { %414 = vst.msk [vmem:[#allocation5 + $0xb0] sm:$0x1f] %vm391_vm0, %v388_v50 }
  0xc2   :  { %v315_v26 = vpop.permute.xlu0 %314 }
  0xc3   :  { %v365_v31 = vadd.f32 %v315_v26, %v608_v55 }
  0xc5   :  { %v390_v10 = vmul.f32 0.0625, %v365_v31 }
  0xc7   :  { %416 = vst.msk [vmem:[#allocation5 + $0xc0] sm:$0x1f] %vm391_vm0, %v390_v10 }
  0xc8   :  { %429 = dma.vmem_to_hbm [thread:$0]  %s422_s14, 3200, %s424_s17, [#allocation4], %s494_s11, %s494_s11, %s495_s12  }
  0xc9   :  { %491 = dma.done.wait [#allocation4], 3200  }
  0xca   :  { %492 = vsyncadd [#allocation4], 4294964096 }
  0xcb   :  { %434 = vsyncpa [#allocation3], 1 }
  0xcc   :  { %435 = vsyncpa [#allocation4], 1 }

</bundles_post_ra>
